<compile_context>
chip_gen: v7x
topology: tpu7x:2x2x1
jax: 0.10.0
libtpu: 0.0.40
codegen_flags: <defaults>
</compile_context>

<pallas_src>
import functools

import jax
import jax.numpy as jnp
from jax.experimental import pallas as pl
from jax.experimental.pallas import tpu as pltpu

LN_EPS = 1e-5  # torch.nn.LayerNorm default eps


def _layernorm(x, gamma, beta):
    # x: (B, H) f32, gamma/beta: (1, H) f32 ; normalize over last dim
    mean = jnp.mean(x, axis=-1, keepdims=True)
    centered = x - mean
    var = jnp.mean(centered * centered, axis=-1, keepdims=True)
    inv = jax.lax.rsqrt(var + LN_EPS)
    return centered * inv * gamma + beta


def transition_gru_kernel(ht_ref, w_ref, gr_ref, br_ref, gz_ref, bz_ref, bc_ref,
                          out_ref, acc_ref, *, hidden, block_k):
    """Grid = (batch tiles, K tiles). K (contraction) is the last/'arbitrary' axis."""
    k = pl.program_id(1)
    nk = pl.num_programs(1)

    @pl.when(k == 0)
    def _():
        acc_ref[...] = jnp.zeros_like(acc_ref)

    # K-chunk of the hidden state, cast to the weight dtype (bf16) so the MXU
    # runs its fast low-precision path with f32 accumulation.
    k_start = pl.multiple_of(k * block_k, block_k)
    ht_chunk = ht_ref[:, pl.ds(k_start, block_k)].astype(w_ref.dtype)
    acc_ref[...] += jnp.dot(ht_chunk, w_ref[...],
                            preferred_element_type=jnp.float32)

    # Epilogue: LayerNorm + gates + output mix only on the last K step.
    @pl.when(k == nk - 1)
    def _():
        H = hidden
        acc = acc_ref[...]                      # (tb, 3H) f32 pre-activations
        r = jax.nn.sigmoid(_layernorm(acc[:, :H], gr_ref[...], br_ref[...]))
        z = jax.nn.sigmoid(_layernorm(acc[:, H:2 * H], gz_ref[...], bz_ref[...]))
        n = jnp.tanh(r * (acc[:, 2 * H:] + bc_ref[...]))
        # TODO(synk): nn.Dropout(0.3) is identity in eval mode; training-mode
        # dropout would draw a mask via pltpu.prng_seed / prng_random_bits.
        ht_f32 = ht_ref[...].astype(jnp.float32)
        out = (1.0 - z) * n + z * ht_f32
        out_ref[...] = out.astype(out_ref.dtype)


def transition_gru(ht, params, *, block_b=None, block_k=None):
    """ht: (B, H). params: dict with fused weight 'w' (H, 3H) plus LN/bias vectors."""
    B, H = ht.shape
    w = params["w"]                              # (H, 3H) = [Wr | Wz | Wc]
    gr, br = params["gr"], params["br"]
    gz, bz = params["gz"], params["bz"]
    bc = params["bc"]
    assert w.shape == (H, 3 * H)

    if block_b is None:
        block_b = B if B <= 128 else 128         # cap batch tile -> vreg pressure
    if block_k is None:
        block_k = H if H <= 512 else 512         # weight K-tile (bf16 slab fits VMEM)
    assert B % block_b == 0, "batch must be divisible by the batch tile"
    assert H % block_k == 0, "hidden must be divisible by the K tile"

    grid = (B // block_b, H // block_k)
    kernel = functools.partial(transition_gru_kernel, hidden=H, block_k=block_k)

    vec_spec = pl.BlockSpec((1, H), lambda i, k: (0, 0))
    itemsize = lambda a: jnp.dtype(a.dtype).itemsize
    cost = pl.CostEstimate(
        flops=2 * B * H * 3 * H,
        transcendentals=3 * B * H,
        bytes_accessed=(w.size * itemsize(w)              # fused weights
                        + 2 * B * H * itemsize(ht)        # ht in + out
                        + 5 * H * 4),                     # LN params + bias
    )

    return pl.pallas_call(
        kernel,
        out_shape=jax.ShapeDtypeStruct((B, H), ht.dtype),
        grid_spec=pltpu.PrefetchScalarGridSpec(
            num_scalar_prefetch=0,
            grid=grid,
            in_specs=[
                pl.BlockSpec((block_b, H), lambda i, k: (i, 0)),      # ht (resident over k)
                pl.BlockSpec((block_k, 3 * H), lambda i, k: (k, 0)),  # fused weight K-slab
                vec_spec, vec_spec,                                   # gamma_r, beta_r
                vec_spec, vec_spec,                                   # gamma_z, beta_z
                vec_spec,                                             # bc
            ],
            out_specs=pl.BlockSpec((block_b, H), lambda i, k: (i, 0)),
            scratch_shapes=[pltpu.VMEM((block_b, 3 * H), jnp.float32)],
        ),
        compiler_params=pltpu.CompilerParams(
            dimension_semantics=("parallel", "arbitrary"),
            vmem_limit_bytes=32 * 1024 * 1024,   # raises v5e's 16 MiB scoped default
        ),
        cost_estimate=cost,
    )(ht, w, gr, br, gz, bz, bc)


def init_params(key, hidden_units, weight_dtype=jnp.bfloat16):
    """Deterministic synthetic parameters matching TransitionGRU.__init__ shapes.

    The three gate weights are packed ONCE into a fused (H, 3H) matrix so the
    kernel performs a single MXU matmul per call.
    """
    k_r, k_z, k_cw, k_cb = jax.random.split(key, 4)
    H = hidden_units
    scale = 1.0 / float(H) ** 0.5
    wr = jax.random.normal(k_r, (H, H), jnp.float32) * scale          # param(H, H)
    wz = jax.random.normal(k_z, (H, H), jnp.float32) * scale          # param(H, H)
    # nn.Linear(H, H): weight stored here already transposed -> (H_in, H_out)
    wc = jax.random.uniform(k_cw, (H, H), jnp.float32, minval=-scale, maxval=scale)
    return {
        "w": jnp.concatenate([wr, wz, wc], axis=1).astype(weight_dtype),  # (H, 3H)
        # LayerNorm default init: gamma=1, beta=0 (stored as (1, H) rows)
        "gr": jnp.ones((1, H), jnp.float32),
        "br": jnp.zeros((1, H), jnp.float32),
        "gz": jnp.ones((1, H), jnp.float32),
        "bz": jnp.zeros((1, H), jnp.float32),
        "bc": jax.random.uniform(k_cb, (1, H), jnp.float32,
                                 minval=-scale, maxval=scale),
    }


def transition_gru_ref(ht, params):
    """Pure-JAX reference (same bf16-matmul / f32-elementwise recipe)."""
    H = ht.shape[1]
    w = params["w"]
    pre = jnp.dot(ht.astype(w.dtype), w, preferred_element_type=jnp.float32)
    r = jax.nn.sigmoid(_layernorm(pre[:, :H], params["gr"], params["br"]))
    z = jax.nn.sigmoid(_layernorm(pre[:, H:2 * H], params["gz"], params["bz"]))
    n = jnp.tanh(r * (pre[:, 2 * H:] + params["bc"]))
    ht32 = ht.astype(jnp.float32)
    out = (1.0 - z) * n + z * ht32
    return out.astype(ht.dtype)


if __name__ == "__main__":
    B, H = 8, 128  # batch, hidden_units (128 keeps lane-dim alignment)
    key = jax.random.PRNGKey(0)
    k_x, k_p = jax.random.split(key)
    ht = jax.random.normal(k_x, (B, H), jnp.float32)
    params = init_params(k_p, H, weight_dtype=jnp.bfloat16)

    out = transition_gru(ht, params)
    jax.block_until_ready(out)

    ref = transition_gru_ref(ht, params)
    assert out.shape == (B, H) and out.dtype == ht.dtype
    max_err = float(jnp.max(jnp.abs(out.astype(jnp.float32) - ref.astype(jnp.float32))))
    assert max_err < 2e-2, f"mismatch vs reference: max abs err {max_err}"
    print("KERNEL_OK")
</pallas_src>

<mosaic_0001>
module attributes {stable_mosaic.version = 11 : i64} {
  func.func @transition_gru_kernel(%arg0: i32, %arg1: i32, %arg2: memref<8x128xf32, #tpu.memory_space<vmem>>, %arg3: memref<128x384xbf16, #tpu.memory_space<vmem>>, %arg4: memref<1x128xf32, #tpu.memory_space<vmem>>, %arg5: memref<1x128xf32, #tpu.memory_space<vmem>>, %arg6: memref<1x128xf32, #tpu.memory_space<vmem>>, %arg7: memref<1x128xf32, #tpu.memory_space<vmem>>, %arg8: memref<1x128xf32, #tpu.memory_space<vmem>>, %arg9: memref<8x128xf32, #tpu.memory_space<vmem>>, %arg10: memref<8x384xf32, #tpu.memory_space<vmem>>) attributes {dimension_semantics = [#tpu.dimension_semantics<parallel>, #tpu.dimension_semantics<arbitrary>], iteration_bounds = array<i64: 1, 1>, scalar_prefetch = 0 : i64, scratch_operands = 1 : i64, tpu.core_type = #tpu.core_type<tc>, window_params = [{transform_indices = @transform_0, window_bounds = array<i64: 8, 128>}, {transform_indices = @transform_1, window_bounds = array<i64: 128, 384>}, {pipeline_mode = #tpu.pipeline_mode<synchronous>, transform_indices = @transform_2, window_bounds = array<i64: 1, 128>}, {pipeline_mode = #tpu.pipeline_mode<synchronous>, transform_indices = @transform_3, window_bounds = array<i64: 1, 128>}, {pipeline_mode = #tpu.pipeline_mode<synchronous>, transform_indices = @transform_4, window_bounds = array<i64: 1, 128>}, {pipeline_mode = #tpu.pipeline_mode<synchronous>, transform_indices = @transform_5, window_bounds = array<i64: 1, 128>}, {pipeline_mode = #tpu.pipeline_mode<synchronous>, transform_indices = @transform_6, window_bounds = array<i64: 1, 128>}, {transform_indices = @transform_7, window_bounds = array<i64: 8, 128>}]} {
    %c0_i32 = arith.constant 0 : i32
    %0 = arith.cmpi eq, %arg1, %c0_i32 : i32
    %1 = arith.extui %0 : i1 to i32
    %c0_i32_0 = arith.constant 0 : i32
    %2 = arith.cmpi ne, %1, %c0_i32_0 : i32
    scf.if %2 {
      %cst_9 = arith.constant 0.000000e+00 : f32
      %16 = vector.broadcast %cst_9 : f32 to vector<8x384xf32>
      %c0_10 = arith.constant 0 : index
      %c0_11 = arith.constant 0 : index
      %17 = vector.load %arg10[%c0_10, %c0_11] : memref<8x384xf32, #tpu.memory_space<vmem>>, vector<8x384xf32>
      tpu.vector_store %arg10[%c0_10, %c0_11], %16 {strides = array<i32>} : memref<8x384xf32, #tpu.memory_space<vmem>>, vector<8x384xf32>,
    } else {
    }
    %c128_i32 = arith.constant 128 : i32
    %3 = arith.muli %arg1, %c128_i32 : i32
    %4 = tpu.assume_multiple %3, 128 : i32
    %c0 = arith.constant 0 : index
    %5 = arith.index_cast %4 : i32 to index
    %6 = vector.load %arg2[%c0, %5] : memref<8x128xf32, #tpu.memory_space<vmem>>, vector<8x128xf32>
    %7 = arith.truncf %6 : vector<8x128xf32> to vector<8x128xbf16>
    %c0_1 = arith.constant 0 : index
    %c0_2 = arith.constant 0 : index
    %8 = vector.load %arg10[%c0_1, %c0_2] : memref<8x384xf32, #tpu.memory_space<vmem>>, vector<8x384xf32>
    %c0_3 = arith.constant 0 : index
    %c0_4 = arith.constant 0 : index
    %9 = vector.load %arg3[%c0_3, %c0_4] : memref<128x384xbf16, #tpu.memory_space<vmem>>, vector<128x384xbf16>
    %cst = arith.constant dense<0.000000e+00> : vector<8x384xf32>
    %10 = tpu.matmul %7, %9, %cst {dimension_numbers = #tpu.dot_dimension_numbers<[1], [0], [0], [1], [0, 0, 1, 1], [], []>} : vector<8x128xbf16>, vector<128x384xbf16>, vector<8x384xf32> -> vector<8x384xf32>
    %11 = arith.addf %8, %10 : vector<8x384xf32>
    %c0_5 = arith.constant 0 : index
    %c0_6 = arith.constant 0 : index
    %12 = vector.load %arg10[%c0_5, %c0_6] : memref<8x384xf32, #tpu.memory_space<vmem>>, vector<8x384xf32>
    tpu.vector_store %arg10[%c0_5, %c0_6], %11 {strides = array<i32>} : memref<8x384xf32, #tpu.memory_space<vmem>>, vector<8x384xf32>,
    %c0_i32_7 = arith.constant 0 : i32
    %13 = arith.cmpi eq, %arg1, %c0_i32_7 : i32
    %14 = arith.extui %13 : i1 to i32
    %c0_i32_8 = arith.constant 0 : i32
    %15 = arith.cmpi ne, %14, %c0_i32_8 : i32
    scf.if %15 {
      %c0_9 = arith.constant 0 : index
      %c0_10 = arith.constant 0 : index
      %16 = vector.load %arg10[%c0_9, %c0_10] : memref<8x384xf32, #tpu.memory_space<vmem>>, vector<8x384xf32>
      %17 = vector.extract_strided_slice %16 {offsets = [0, 0], sizes = [8, 128], strides = [1, 1]} : vector<8x384xf32> to vector<8x128xf32>
      %c0_11 = arith.constant 0 : index
      %c0_12 = arith.constant 0 : index
      %18 = vector.load %arg4[%c0_11, %c0_12] : memref<1x128xf32, #tpu.memory_space<vmem>>, vector<1x128xf32>
      %c0_13 = arith.constant 0 : index
      %c0_14 = arith.constant 0 : index
      %19 = vector.load %arg5[%c0_13, %c0_14] : memref<1x128xf32, #tpu.memory_space<vmem>>, vector<1x128xf32>
      %cst_15 = arith.constant dense<0.000000e+00> : vector<8xf32>
      %20 = vector.multi_reduction <add>, %17, %cst_15 [1] : vector<8x128xf32> to vector<8xf32>
      %21 = vector.shape_cast %20 : vector<8xf32> to vector<8x1xf32>
      %cst_16 = arith.constant 1.280000e+02 : f32
      %22 = vector.broadcast %cst_16 : f32 to vector<8x1xf32>
      %23 = arith.divf %21, %22 : vector<8x1xf32>
      %24 = vector.broadcast %23 : vector<8x1xf32> to vector<8x128xf32>
      %25 = arith.subf %17, %24 : vector<8x128xf32>
      %26 = arith.mulf %25, %25 : vector<8x128xf32>
      %cst_17 = arith.constant dense<0.000000e+00> : vector<8xf32>
      %27 = vector.multi_reduction <add>, %26, %cst_17 [1] : vector<8x128xf32> to vector<8xf32>
      %28 = vector.shape_cast %27 : vector<8xf32> to vector<8x1xf32>
      %cst_18 = arith.constant 1.280000e+02 : f32
      %29 = vector.broadcast %cst_18 : f32 to vector<8x1xf32>
      %30 = arith.divf %28, %29 : vector<8x1xf32>
      %cst_19 = arith.constant 9.99999974E-6 : f32
      %31 = vector.broadcast %cst_19 : f32 to vector<8x1xf32>
      %32 = arith.addf %30, %31 : vector<8x1xf32>
      %33 = math.rsqrt %32 : vector<8x1xf32>
      %34 = vector.broadcast %33 : vector<8x1xf32> to vector<8x128xf32>
      %35 = arith.mulf %25, %34 : vector<8x128xf32>
      %36 = vector.broadcast %18 : vector<1x128xf32> to vector<8x128xf32>
      %37 = arith.mulf %35, %36 : vector<8x128xf32>
      %38 = vector.broadcast %19 : vector<1x128xf32> to vector<8x128xf32>
      %39 = arith.addf %37, %38 : vector<8x128xf32>
      %40 = arith.negf %39 : vector<8x128xf32>
      %41 = math.exp %40 : vector<8x128xf32>
      %cst_20 = arith.constant 1.000000e+00 : f32
      %42 = vector.broadcast %cst_20 : f32 to vector<8x128xf32>
      %43 = arith.addf %42, %41 : vector<8x128xf32>
      %44 = arith.divf %42, %43 : vector<8x128xf32>
      %45 = vector.extract_strided_slice %16 {offsets = [0, 128], sizes = [8, 128], strides = [1, 1]} : vector<8x384xf32> to vector<8x128xf32>
      %c0_21 = arith.constant 0 : index
      %c0_22 = arith.constant 0 : index
      %46 = vector.load %arg6[%c0_21, %c0_22] : memref<1x128xf32, #tpu.memory_space<vmem>>, vector<1x128xf32>
      %c0_23 = arith.constant 0 : index
      %c0_24 = arith.constant 0 : index
      %47 = vector.load %arg7[%c0_23, %c0_24] : memref<1x128xf32, #tpu.memory_space<vmem>>, vector<1x128xf32>
      %cst_25 = arith.constant dense<0.000000e+00> : vector<8xf32>
      %48 = vector.multi_reduction <add>, %45, %cst_25 [1] : vector<8x128xf32> to vector<8xf32>
      %49 = vector.shape_cast %48 : vector<8xf32> to vector<8x1xf32>
      %cst_26 = arith.constant 1.280000e+02 : f32
      %50 = vector.broadcast %cst_26 : f32 to vector<8x1xf32>
      %51 = arith.divf %49, %50 : vector<8x1xf32>
      %52 = vector.broadcast %51 : vector<8x1xf32> to vector<8x128xf32>
      %53 = arith.subf %45, %52 : vector<8x128xf32>
      %54 = arith.mulf %53, %53 : vector<8x128xf32>
      %cst_27 = arith.constant dense<0.000000e+00> : vector<8xf32>
      %55 = vector.multi_reduction <add>, %54, %cst_27 [1] : vector<8x128xf32> to vector<8xf32>
      %56 = vector.shape_cast %55 : vector<8xf32> to vector<8x1xf32>
      %cst_28 = arith.constant 1.280000e+02 : f32
      %57 = vector.broadcast %cst_28 : f32 to vector<8x1xf32>
      %58 = arith.divf %56, %57 : vector<8x1xf32>
      %cst_29 = arith.constant 9.99999974E-6 : f32
      %59 = vector.broadcast %cst_29 : f32 to vector<8x1xf32>
      %60 = arith.addf %58, %59 : vector<8x1xf32>
      %61 = math.rsqrt %60 : vector<8x1xf32>
      %62 = vector.broadcast %61 : vector<8x1xf32> to vector<8x128xf32>
      %63 = arith.mulf %53, %62 : vector<8x128xf32>
      %64 = vector.broadcast %46 : vector<1x128xf32> to vector<8x128xf32>
      %65 = arith.mulf %63, %64 : vector<8x128xf32>
      %66 = vector.broadcast %47 : vector<1x128xf32> to vector<8x128xf32>
      %67 = arith.addf %65, %66 : vector<8x128xf32>
      %68 = arith.negf %67 : vector<8x128xf32>
      %69 = math.exp %68 : vector<8x128xf32>
      %cst_30 = arith.constant 1.000000e+00 : f32
      %70 = vector.broadcast %cst_30 : f32 to vector<8x128xf32>
      %71 = arith.addf %70, %69 : vector<8x128xf32>
      %72 = arith.divf %70, %71 : vector<8x128xf32>
      %73 = vector.extract_strided_slice %16 {offsets = [0, 256], sizes = [8, 128], strides = [1, 1]} : vector<8x384xf32> to vector<8x128xf32>
      %c0_31 = arith.constant 0 : index
      %c0_32 = arith.constant 0 : index
      %74 = vector.load %arg8[%c0_31, %c0_32] : memref<1x128xf32, #tpu.memory_space<vmem>>, vector<1x128xf32>
      %75 = vector.broadcast %74 : vector<1x128xf32> to vector<8x128xf32>
      %76 = arith.addf %73, %75 : vector<8x128xf32>
      %77 = arith.mulf %44, %76 : vector<8x128xf32>
      %78 = math.tanh %77 : vector<8x128xf32>
      %c0_33 = arith.constant 0 : index
      %c0_34 = arith.constant 0 : index
      %79 = vector.load %arg2[%c0_33, %c0_34] : memref<8x128xf32, #tpu.memory_space<vmem>>, vector<8x128xf32>
      %cst_35 = arith.constant 1.000000e+00 : f32
      %80 = vector.broadcast %cst_35 : f32 to vector<8x128xf32>
      %81 = arith.subf %80, %72 : vector<8x128xf32>
      %82 = arith.mulf %81, %78 : vector<8x128xf32>
      %83 = arith.mulf %72, %79 : vector<8x128xf32>
      %84 = arith.addf %82, %83 : vector<8x128xf32>
      %c0_36 = arith.constant 0 : index
      %c0_37 = arith.constant 0 : index
      %85 = vector.load %arg9[%c0_36, %c0_37] : memref<8x128xf32, #tpu.memory_space<vmem>>, vector<8x128xf32>
      tpu.vector_store %arg9[%c0_36, %c0_37], %84 {strides = array<i32>} : memref<8x128xf32, #tpu.memory_space<vmem>>, vector<8x128xf32>,
    } else {
    }
    return
  }
  func.func @transform_0(%arg0: i32, %arg1: i32) -> (i32, i32) {
    %c0_i32 = arith.constant 0 : i32
    %c0_i32_0 = arith.constant 0 : i32
    return %arg0, %c0_i32 : i32, i32
  }
  func.func @transform_1(%arg0: i32, %arg1: i32) -> (i32, i32) {
    %c0_i32 = arith.constant 0 : i32
    %c0_i32_0 = arith.constant 0 : i32
    return %arg1, %c0_i32 : i32, i32
  }
  func.func @transform_2(%arg0: i32, %arg1: i32) -> (i32, i32) {
    %c0_i32 = arith.constant 0 : i32
    %c0_i32_0 = arith.constant 0 : i32
    %c0_i32_1 = arith.constant 0 : i32
    return %c0_i32, %c0_i32_0 : i32, i32
  }
  func.func @transform_3(%arg0: i32, %arg1: i32) -> (i32, i32) {
    %c0_i32 = arith.constant 0 : i32
    %c0_i32_0 = arith.constant 0 : i32
    %c0_i32_1 = arith.constant 0 : i32
    return %c0_i32, %c0_i32_0 : i32, i32
  }
  func.func @transform_4(%arg0: i32, %arg1: i32) -> (i32, i32) {
    %c0_i32 = arith.constant 0 : i32
    %c0_i32_0 = arith.constant 0 : i32
    %c0_i32_1 = arith.constant 0 : i32
    return %c0_i32, %c0_i32_0 : i32, i32
  }
  func.func @transform_5(%arg0: i32, %arg1: i32) -> (i32, i32) {
    %c0_i32 = arith.constant 0 : i32
    %c0_i32_0 = arith.constant 0 : i32
    %c0_i32_1 = arith.constant 0 : i32
    return %c0_i32, %c0_i32_0 : i32, i32
  }
  func.func @transform_6(%arg0: i32, %arg1: i32) -> (i32, i32) {
    %c0_i32 = arith.constant 0 : i32
    %c0_i32_0 = arith.constant 0 : i32
    %c0_i32_1 = arith.constant 0 : i32
    return %c0_i32, %c0_i32_0 : i32, i32
  }
  func.func @transform_7(%arg0: i32, %arg1: i32) -> (i32, i32) {
    %c0_i32 = arith.constant 0 : i32
    %c0_i32_0 = arith.constant 0 : i32
    return %arg0, %c0_i32 : i32, i32
  }
}

</mosaic_0001>

<bundles_post_ra>
// kernel: tpu_custom_call.1
= control target key start
LH: loop header
LB: loop body
LE: loop exit
PB: predicated region body
PF: predicated region fallthrough
CT: control target
= control target key end

     0   :  { %12 = vsyncpa [#allocation4], 0  ;;  %s720_s0 = inlined_call_operand.hbm [shape: f32[8,128], index: 0, kind: input, shape index: {}]   ;;  %s721_s1 = inlined_call_operand.hbm [shape: bf16[128,384], index: 1, kind: input, shape index: {}]   ;;  %s722_s2 = inlined_call_operand.vmem [shape: f32[1,128], index: 2, kind: input, shape index: {}]   ;;  %s723_s3 = inlined_call_operand.vmem [shape: f32[1,128], index: 3, kind: input, shape index: {}]   ;;  %s724_s4 = inlined_call_operand.vmem [shape: f32[1,128], index: 4, kind: input, shape index: {}]   ;;  %s725_s5 = inlined_call_operand.vmem [shape: f32[1,128], index: 5, kind: input, shape index: {}]   ;;  %s726_s6 = inlined_call_operand.vmem [shape: f32[1,128], index: 6, kind: input, shape index: {}]   ;;  %s727_s7 = inlined_call_operand.hbm [shape: f32[8,128], index: 7, kind: output, shape index: {}]  }
   0x1   :  { %13 = vsyncpa [#allocation7], 0 }
   0x2   :  { %14 = vsyncpa [#allocation5], 0  ;;  %s609_s24 = smov [#allocation3]   ;;  %s610_s26 = smov [#allocation6]  }
   0x3   :  { %s21_s25 = sshll.u32 %s609_s24, 4  ;;  %s30_s27 = sshll.u32 %s610_s26, 4  ;;  %s22_s25 = int_to_ptr.vmem [resolvable:$true] %s21_s25  ;;  %s657_s27 = int_to_ptr.vmem [resolvable:$true] %s30_s27 }
   0x4   :  { %s537_s30 = scalar_lea.hbm %s720_s0, 128 }
   0x5   :  { %p538_p0 = scmp.ne.s32.totalorder %s720_s0, %s537_s30  ;;  %p541_p1 = scmp.lt.u32.totalorder %s537_s30, %s720_s0 }
   0x7   :  { %p543_p2 = pnand %p541_p1, %p538_p0 }
   0x9   :  { %546 = shalt.err (!%p543_p2)
}
   0xa   :  { %s547_s12 = scalar_lea.vmem %s22_s25, 128  ;;  %p552_p4 = scmp.lt.s32.totalorder %s22_s25, %s22_s25 }
   0xb   :  { %p548_p3 = scmp.ne.s32.totalorder %s22_s25, %s547_s12  ;;  %p553_p5 = scmp.lt.s32.totalorder %s547_s12, %s547_s12 }
   0xd   :  { %p554_p6 = por %p553_p5, %p552_p4 }
   0xf   :  { %p555_p7 = pnand %p554_p6, %p548_p3 }
  0x11   :  { %558 = shalt.err (!%p555_p7)
}
  0x12   :  { %24 = dma.hbm_to_vmem [thread:$0]  %s720_s0, 128, %s22_s25, [#allocation4]  }
  0x13   :  { %s559_s17 = scalar_lea.hbm %s721_s1, 3072 }
  0x14   :  { %p560_p8 = scmp.ne.s32.totalorder %s721_s1, %s559_s17  ;;  %p563_p9 = scmp.lt.u32.totalorder %s559_s17, %s721_s1 }
  0x16   :  { %p565_p10 = pnand %p563_p9, %p560_p8 }
  0x18   :  { %568 = shalt.err (!%p565_p10)
}
  0x19   :  { %s569_s22 = scalar_lea.vmem %s657_s27, 3072  ;;  %p574_p12 = scmp.lt.s32.totalorder %s657_s27, %s657_s27 }
  0x1a   :  { %p570_p11 = scmp.ne.s32.totalorder %s657_s27, %s569_s22  ;;  %p575_p13 = scmp.lt.s32.totalorder %s569_s22, %s569_s22 }
  0x1c   :  { %p576_p0 = por %p575_p13, %p574_p12 }
  0x1e   :  { %p577_p1 = pnand %p576_p0, %p570_p11 }
  0x20   :  { %580 = shalt.err (!%p577_p1)
}
  0x21   :  { %s611_s0 = smov 192   ;;  %s612_s23 = smov 12  }
  0x22   :  { %36 = dma.hbm_to_vmem [thread:$0]  %s721_s1, 3072, %s657_s27, [#allocation7], %s611_s0, %s611_s0, %s612_s23  }
  0x23   :  { %603 = dma.done.wait [#allocation4], 128  }
  0x24   :  { %604 = vsyncadd [#allocation4], 4294967168 }
  0x25   :  { %605 = dma.done.wait [#allocation7], 3072  }
  0x26   :  { %606 = vsyncadd [#allocation7], 4294964224  ;;  %v613_v0 = vmov 0   ;;  %v491_v1 = vld [vmem:[#allocation6 + $0x4] ss:$12 sps:$4 sm:$0xff]   ;;  %v688_v17 = vld [vmem:[#allocation3] sm:$0xff] }
  0x27   :  { %262 = vmatprep.mubr.bf16.mxu0 %v613_v0  ;;  %v493_v2 = vld [vmem:[#allocation6] ss:$12 sps:$4 sm:$0xff]   ;;  %230 = vmatprep.subr.bf16.mxu0 %v491_v1  ;;  %v494_v3 = vld [vmem:[#allocation6 + $0x1c] ss:$12 sps:$4 sm:$0xff]   ;;  %v496_v4 = vld [vmem:[#allocation6 + $0x18] ss:$12 sps:$4 sm:$0xff]   ;;  %v66_v18 = vpack.c.bf16 %v688_v17, %v688_v17 }
  0x28   :  { %231 = vmatpush1.bf16.msra.mxu0 %v493_v2  ;;  %v497_v5 = vld [vmem:[#allocation6 + $0x34] ss:$12 sps:$4 sm:$0xff]   ;;  %v499_v6 = vld [vmem:[#allocation6 + $0x30] ss:$12 sps:$4 sm:$0xff]   ;;  %v500_v7 = vld [vmem:[#allocation6 + $0x4c] ss:$12 sps:$4 sm:$0xff]  }
  0x29   :  { %232 = vmatprep.subr.bf16.mxu0 %v494_v3  ;;  %v502_v8 = vld [vmem:[#allocation6 + $0x48] ss:$12 sps:$4 sm:$0xff]   ;;  %v503_v9 = vld [vmem:[#allocation6 + $0x64] ss:$12 sps:$4 sm:$0xff]   ;;  %v505_v10 = vld [vmem:[#allocation6 + $0x60] ss:$12 sps:$4 sm:$0xff]  }
  0x2a   :  { %v506_v11 = vld [vmem:[#allocation6 + $0x7c] ss:$12 sps:$4 sm:$0xff]   ;;  %v508_v12 = vld [vmem:[#allocation6 + $0x78] ss:$12 sps:$4 sm:$0xff]   ;;  %v509_v13 = vld [vmem:[#allocation6 + $0x94] ss:$12 sps:$4 sm:$0xff]  }
  0x2b   :  { %v511_v14 = vld [vmem:[#allocation6 + $0x90] ss:$12 sps:$4 sm:$0xff]   ;;  %v512_v15 = vld [vmem:[#allocation6 + $0xac] ss:$12 sps:$4 sm:$0xff]   ;;  %v514_v16 = vld [vmem:[#allocation6 + $0xa8] ss:$12 sps:$4 sm:$0xff]  }
  0x2c   :  { %233 = vmatpush1.bf16.msra.mxu0 %v496_v4  ;;  %v515_v19 = vld [vmem:[#allocation6 + $0x8] ss:$12 sps:$4 sm:$0xff]   ;;  %v614_v20 = vmov 0.0   ;;  %vm615_vm0 = vmmov 0   ;;  %v516_v21 = vld [vmem:[#allocation6 + $0x20] ss:$12 sps:$4 sm:$0xff]  }
  0x2d   :  { %234 = vmatprep.subr.bf16.mxu0 %v497_v5  ;;  %463 = vmatprep.subr.bf16.mxu1 %v614_v20  ;;  %v517_v22 = vld [vmem:[#allocation6 + $0x38] ss:$12 sps:$4 sm:$0xff]   ;;  %v518_v23 = vld [vmem:[#allocation6 + $0x50] ss:$12 sps:$4 sm:$0xff]   ;;  %v519_v24 = vld [vmem:[#allocation6 + $0x68] ss:$12 sps:$4 sm:$0xff]  }
  0x2e   :  { %479 = vmatprep.mubr.msk.bf16.mxu1 %vm615_vm0, %v614_v20  ;;  %464 = vmatpush3.bf16.msra.mxu1 %v515_v19  ;;  %v520_v25 = vld [vmem:[#allocation6 + $0x80] ss:$12 sps:$4 sm:$0xff]   ;;  %v521_v26 = vld [vmem:[#allocation6 + $0x98] ss:$12 sps:$4 sm:$0xff]   ;;  %v522_v27 = vld [vmem:[#allocation6 + $0xb0] ss:$12 sps:$4 sm:$0xff]  }
  0x2f   :  { %465 = vmatprep.subr.bf16.mxu1 %v614_v20  ;;  %v447_v51 = vld [vmem:[%s722_s2] ss:$0 sm:$0xff] }
  0x30   :  { %235 = vmatpush1.bf16.msra.mxu0 %v499_v6  ;;  %v448_v53 = vld [vmem:[%s723_s3] ss:$0 sm:$0xff] }
  0x31   :  { %236 = vmatprep.subr.bf16.mxu0 %v500_v7  ;;  %v450_v56 = vld [vmem:[%s724_s4] ss:$0 sm:$0xff]  ;;  %s616_s4 = smov [#allocation8]  }
  0x32   :  { %466 = vmatpush3.bf16.msra.mxu1 %v516_v21  ;;  %v451_v59 = vld [vmem:[%s725_s5] ss:$0 sm:$0xff]  ;;  %s412_s5 = sshll.u32 %s616_s4, 4  ;;  %s413_s5 = int_to_ptr.vmem [resolvable:$true] %s412_s5 }
  0x33   :  { %467 = vmatprep.subr.bf16.mxu1 %v614_v20  ;;  %v453_v3 = vld [vmem:[%s726_s6] ss:$0 sm:$0xff]  ;;  %s581_s10 = scalar_lea.vmem %s413_s5, 128  ;;  %p586_p3 = scmp.lt.s32.totalorder %s413_s5, %s413_s5 }
  0x34   :  { %237 = vmatpush1.bf16.msra.mxu0 %v502_v8  ;;  %p582_p2 = scmp.ne.s32.totalorder %s413_s5, %s581_s10  ;;  %p587_p4 = scmp.lt.s32.totalorder %s581_s10, %s581_s10 }
  0x35   :  { %238 = vmatprep.subr.bf16.mxu0 %v503_v9 }
  0x36   :  { %468 = vmatpush3.bf16.msra.mxu1 %v517_v22  ;;  %p588_p5 = por %p587_p4, %p586_p3 }
  0x37   :  { %469 = vmatprep.subr.bf16.mxu1 %v614_v20 }
  0x38   :  { %239 = vmatpush1.bf16.msra.mxu0 %v505_v10  ;;  %p589_p6 = pnand %p588_p5, %p582_p2 }
  0x39   :  { %240 = vmatprep.subr.bf16.mxu0 %v506_v11 }
  0x3a   :  { %470 = vmatpush3.bf16.msra.mxu1 %v518_v23 }
  0x3b   :  { %471 = vmatprep.subr.bf16.mxu1 %v614_v20 }
  0x3c   :  { %241 = vmatpush1.bf16.msra.mxu0 %v508_v12 }
  0x3d   :  { %242 = vmatprep.subr.bf16.mxu0 %v509_v13 }
  0x3e   :  { %472 = vmatpush3.bf16.msra.mxu1 %v519_v24 }
  0x3f   :  { %473 = vmatprep.subr.bf16.mxu1 %v614_v20 }
  0x40   :  { %243 = vmatpush1.bf16.msra.mxu0 %v511_v14 }
  0x41   :  { %244 = vmatprep.subr.bf16.mxu0 %v512_v15 }
  0x42   :  { %474 = vmatpush3.bf16.msra.mxu1 %v520_v25 }
  0x43   :  { %475 = vmatprep.subr.bf16.mxu1 %v614_v20 }
  0x44   :  { %245 = vmatpush1.bf16.msra.mxu0 %v514_v16 }
  0x46   :  { %476 = vmatpush3.bf16.msra.mxu1 %v521_v26 }
  0x47   :  { %263 = vmatmul.mubr.bf16.vlgmr.msra.gmra.mrb[0].mxu0 %v66_v18  ;;  %477 = vmatprep.subr.bf16.mxu1 %v614_v20 }
  0x4a   :  { %478 = vmatpush3.bf16.msra.mxu1 %v522_v27 }
  0x4d   :  { %480 = vmatmul.mubr.bf16.vlgmr.msra.gmra.mrb[0].mxu1 %v66_v18 }
 0x11a   :  { %v264_v28 = vpop.f32.mrb[0].mxu0 }
 0x11b   :  { %325 = vadd.xlane.f32.xlu0 %v264_v28  ;;  %v266_v29 = vpop.f32.mrb[1].mxu0 }
 0x11c   :  { %v268_v30 = vpop.f32.mrb[2].mxu0 }
 0x11d   :  { %v269_v31 = vpop.f32.mrb[3].mxu0 }
 0x11f   :  { %359 = vadd.xlane.f32.xlu0 %v266_v29 }
 0x120   :  { %v305_v40 = vpop.f32.mrb[0].mxu1 }
 0x121   :  { %v481_v41 = vpop.f32.mrb[1].mxu1  ;;  %v397_v5 = vadd.f32 %v453_v3, %v305_v40 }
 0x122   :  { %v308_v42 = vpop.f32.mrb[2].mxu1 }
 0x123   :  { %v482_v43 = vpop.f32.mrb[3].mxu1 }
 0x1a8   :  { %v326_v32 = vpop.xlane.xlu0 %325 }
 0x1a9   :  { %v328_v33 = vmul.f32 0.0078125, %v326_v32 }
 0x1ab   :  { %v329_v34 = vsub.f32 %v264_v28, %v328_v33 }
 0x1ac   :  { %v360_v35 = vpop.xlane.xlu0 %359 }
 0x1ad   :  { %v361_v36 = vmul.f32 0.0078125, %v360_v35  ;;  %v330_v37 = vmul.f32 %v329_v34, %v329_v34 }
 0x1af   :  { %v362_v38 = vsub.f32 %v266_v29, %v361_v36  ;;  %331 = vadd.xlane.f32.xlu1 %v330_v37 }
 0x1b1   :  { %v363_v39 = vmul.f32 %v362_v38, %v362_v38 }
 0x1b3   :  { %364 = vadd.xlane.f32.xlu1 %v363_v39 }
 0x23c   :  { %v332_v44 = vpop.xlane.xlu1 %331 }
 0x23d   :  { %v333_v45 = vmul.f32 0.0078125, %v332_v44 }
 0x23f   :  { %v334_v46 = vadd.f32 1e-05, %v333_v45 }
 0x240   :  { %v365_v47 = vpop.xlane.xlu1 %364 }
 0x241   :  { %523 = vrsqrt.f32 %v334_v46  ;;  %v366_v48 = vmul.f32 0.0078125, %v365_v47 }
 0x243   :  { %v367_v49 = vadd.f32 1e-05, %v366_v48 }
 0x245   :  { %525 = vrsqrt.f32 %v367_v49 }
 0x24b   :  { %v524_v50 = vpop.eup %523 }
 0x24c   :  { %v336_v52 = vmul.f32 %v524_v50, %v329_v34 }
 0x24e   :  { %v343_v54 = vmul.f32 %v447_v51, %v336_v52 }
 0x24f   :  { %v526_v55 = vpop.eup %525 }
 0x250   :  { %v350_v57 = vadd.f32 %v448_v53, %v343_v54  ;;  %v369_v58 = vmul.f32 %v526_v55, %v362_v38 }
 0x252   :  { %v449_v60 = vmul.f32 -1.442695, %v350_v57  ;;  %v376_v61 = vmul.f32 %v450_v56, %v369_v58 }
 0x254   :  { %v383_v62 = vadd.f32 %v451_v59, %v376_v61  ;;  %527 = vpow2.f32 %v449_v60 }
 0x256   :  { %v452_v63 = vmul.f32 -1.442695, %v383_v62 }
 0x258   :  { %529 = vpow2.f32 %v452_v63 }
 0x25e   :  { %v528_v0 = vpop.eup %527 }
 0x25f   :  { %v354_v1 = vadd.f32 1.0, %v528_v0 }
 0x261   :  { %531 = vrcp.f32 %v354_v1 }
 0x262   :  { %v530_v2 = vpop.eup %529 }
 0x263   :  { %v387_v4 = vadd.f32 1.0, %v530_v2 }
 0x265   :  { %533 = vrcp.f32 %v387_v4 }
 0x26b   :  { %v532_v6 = vpop.eup %531 }
 0x26c   :  { %v398_v7 = vmul.f32 %v532_v6, %v397_v5 }
 0x26e   :  { %535 = vtanh.f32 %v398_v7 }
 0x26f   :  { %v534_v8 = vpop.eup %533 }
 0x270   :  { %v401_v9 = vsub.f32 1.0, %v534_v8  ;;  %v403_v12 = vmul.f32 %v534_v8, %v688_v17 }
 0x278   :  { %v536_v10 = vpop.eup %535 }
 0x279   :  { %v402_v11 = vmul.f32 %v536_v10, %v401_v9 }
 0x27b   :  { %v404_v13 = vadd.f32 %v403_v12, %v402_v11 }
 0x27d   :  { %405 = vst [vmem:[#allocation8] sm:$0xff] %v404_v13 }
 0x27e   :  { %592 = shalt.err (!%p589_p6)
}
 0x27f   :  { %s593_s12 = scalar_lea.hbm %s727_s7, 128 }
 0x280   :  { %p594_p7 = scmp.ne.s32.totalorder %s727_s7, %s593_s12  ;;  %p597_p8 = scmp.lt.u32.totalorder %s593_s12, %s727_s7 }
 0x282   :  { %p599_p9 = pnand %p597_p8, %p594_p7 }
 0x284   :  { %602 = shalt.err (!%p599_p9)
}
 0x285   :  { %415 = dma.vmem_to_hbm [thread:$0]  %s413_s5, 128, %s727_s7, [#allocation5]  }
 0x286   :  { %607 = dma.done.wait [#allocation5], 128  }
 0x287   :  { %608 = vsyncadd [#allocation5], 4294967168 }
 0x288   :  { %419 = vsyncpa [#allocation4], 1 }
 0x289   :  { %420 = vsyncpa [#allocation7], 1 }
 0x28a   :  { %421 = vsyncpa [#allocation5], 1 }

</bundles_post_ra>
